<compile_context>
chip_gen: v7x
topology: tpu7x:2x2x1
jax: 0.10.0
libtpu: 0.0.40
codegen_flags: <defaults>
</compile_context>

<pallas_src>
import functools

import jax
import jax.numpy as jnp
from jax import lax
from jax.experimental import pallas as pl
from jax.experimental.pallas import tpu as pltpu


# --------------------------------------------------------------------------- #
# Shared per-tile math
# --------------------------------------------------------------------------- #
def _assign_and_project(x_t, wp_ref, bnb_ref, cm2s_ref, scl_ref, sc2_ref,
                        valid=None):
    """One lane-tile of work: 1x1 conv + BN + ReLU, scaled-L2 softmax assignment.

    x_t: (C, T) f32.  Returns (proj_bf16 (C, T), a_f32 (K, T)).
    `valid` (1, T) bool masks padded tail columns (both proj and a are zeroed
    there so they contribute nothing to the accumulators).
    """
    xb = x_t.astype(jnp.bfloat16)
    proj = jnp.dot(wp_ref[...], xb, preferred_element_type=jnp.float32)
    proj = jnp.maximum(proj + bnb_ref[...], 0.0)                       # (C, T)
    if valid is not None:
        proj = jnp.where(valid, proj, 0.0)
    pb = proj.astype(jnp.bfloat16)

    # s[k,n] = scale_k*||p_n||^2 + scale_k*||c_k||^2 - 2*scale_k*<p_n, c_k>
    x2 = jnp.sum(proj * proj, axis=0, keepdims=True)                   # (1, T)
    xcs = jnp.dot(cm2s_ref[...], pb, preferred_element_type=jnp.float32)  # (K, T)
    s = scl_ref[...] * x2 + sc2_ref[...] + xcs                         # (K, T)

    m = jnp.max(s, axis=0, keepdims=True)
    e = jnp.exp(s - m)
    a = e * pl.reciprocal(jnp.sum(e, axis=0, keepdims=True), approx=True)
    if valid is not None:
        a = jnp.where(valid, a, 0.0)
    return pb, a


def _gain_from_acc(g_ck, asum_1k, codeT_ref, bn1s_ref, bn1b_ref, wfc_ref, bfc_ref):
    """(C,K) aggregation + (1,K) assignment mass -> per-channel gain (C, 1)."""
    enc = g_ck - asum_1k * codeT_ref[...]                              # (C, K)
    enc = jnp.maximum(enc * bn1s_ref[...] + bn1b_ref[...], 0.0)        # BN1d + ReLU
    feat = jnp.mean(enc, axis=1, keepdims=True)                        # (C, 1)
    z = jnp.dot(wfc_ref[...], feat.astype(jnp.bfloat16),
                preferred_element_type=jnp.float32) + bfc_ref[...]     # (C, 1)
    return 1.0 + 1.0 / (1.0 + jnp.exp(-z))                             # 1 + sigmoid


# --------------------------------------------------------------------------- #
# Fused kernel: whole (C, N) row resident, out = relu(x * (1 + gamma))
# --------------------------------------------------------------------------- #
def enc_fused_kernel(x_ref, wp_ref, bnb_ref, cm2s_ref, codeT_ref, scl_ref,
                     sc2_ref, bn1s_ref, bn1b_ref, wfc_ref, bfc_ref, out_ref):
    x = x_ref[0]                                                       # (C, N) f32
    pb, a = _assign_and_project(x, wp_ref, bnb_ref, cm2s_ref, scl_ref, sc2_ref)
    ab = a.astype(jnp.bfloat16)
    # G[c,k] = sum_n proj[c,n]*a[k,n];  asum[k] = sum_n a[k,n]   (both on MXU)
    g_ck = lax.dot_general(pb, ab, (((1,), (1,)), ((), ())),
                           preferred_element_type=jnp.float32)         # (C, K)
    ones = jnp.ones((1, pb.shape[1]), jnp.bfloat16)
    asum = lax.dot_general(ones, ab, (((1,), (1,)), ((), ())),
                           preferred_element_type=jnp.float32)         # (1, K)
    g1 = _gain_from_acc(g_ck, asum, codeT_ref, bn1s_ref, bn1b_ref, wfc_ref, bfc_ref)
    out_ref[0] = jnp.maximum(x * g1, 0.0).astype(out_ref.dtype)


# --------------------------------------------------------------------------- #
# Two-pass fallback, kernel 1: N-tiled reduction -> g1 = 1 + sigmoid(fc)  (B,C,1)
# --------------------------------------------------------------------------- #
def enc_gamma_kernel(x_ref, wp_ref, bnb_ref, cm2s_ref, codeT_ref, scl_ref,
                     sc2_ref, bn1s_ref, bn1b_ref, wfc_ref, bfc_ref,
                     g1_ref, g_acc, a_acc, *, n_valid, needs_mask):
    t = pl.program_id(1)
    nt = pl.num_programs(1)

    @pl.when(t == 0)
    def _init():
        g_acc[...] = jnp.zeros_like(g_acc)
        a_acc[...] = jnp.zeros_like(a_acc)

    tn = x_ref.shape[2]
    valid = None
    if needs_mask:  # static: only traced when N % TN != 0 (padded tail tile)
        col = t * tn + lax.broadcasted_iota(jnp.int32, (1, tn), 1)
        valid = col < n_valid

    pb, a = _assign_and_project(x_ref[0], wp_ref, bnb_ref, cm2s_ref,
                                scl_ref, sc2_ref, valid)
    ab = a.astype(jnp.bfloat16)
    g_acc[...] += lax.dot_general(pb, ab, (((1,), (1,)), ((), ())),
                                  preferred_element_type=jnp.float32)  # (C, K)
    ones = jnp.ones((1, tn), jnp.bfloat16)
    a_acc[...] += lax.dot_general(ones, ab, (((1,), (1,)), ((), ())),
                                  preferred_element_type=jnp.float32)  # (1, K)

    @pl.when(t == nt - 1)
    def _finalize():
        g1 = _gain_from_acc(g_acc[...], a_acc[...], codeT_ref,
                            bn1s_ref, bn1b_ref, wfc_ref, bfc_ref)      # (C, 1)
        g1_ref[0] = g1.astype(g1_ref.dtype)


# --------------------------------------------------------------------------- #
# Two-pass fallback, kernel 2: out = relu(x * g1)   (pure streaming)
# --------------------------------------------------------------------------- #
def reweight_kernel(x_ref, g1_ref, out_ref):
    out_ref[0] = jnp.maximum(x_ref[0] * g1_ref[0], 0.0)


# --------------------------------------------------------------------------- #
# VMEM budgeting helpers
# --------------------------------------------------------------------------- #
def _round_down_128(v):
    return max(128, (int(v) // 128) * 128)


def _round_up_128(v):
    return ((int(v) + 127) // 128) * 128


def _physical_vmem_bytes():
    try:
        v = int(pltpu.get_tpu_info().vmem_capacity_bytes)
        if v > 0:
            return v
    except Exception:
        pass
    return 64 << 20            # conservative: v7x-class per-core VMEM


def _vmem_limit_bytes():
    phys = _physical_vmem_bytes()
    if phys >= (120 << 20):                       # v5e / v6e class (128 MiB)
        return 96 << 20
    return min(52 << 20, int(phys * 0.8))         # v7x / unknown: keep headroom


def _pick_tile_n(n, per_col_bytes, fixed_bytes, budget_bytes):
    """Largest lane-aligned N-tile fitting the budget; prefer a divisor of N."""
    avail = budget_bytes - fixed_bytes
    tn = avail // max(per_col_bytes, 1)
    if tn >= n:
        return n, False                            # single full tile
    tn = _round_down_128(tn)
    cand = tn
    while cand >= 128:
        if n % cand == 0:
            break
        cand -= 128
    if cand >= 128 and n % cand == 0 and cand * 2 >= tn:
        return cand, False                         # clean divisor, no masking
    return tn, True                                # masked tail tile


# --------------------------------------------------------------------------- #
# Wrapper
# --------------------------------------------------------------------------- #
def enc_module_forward(x_nchw, params, *, force_two_pass=False, tile_n=None):
    """x_nchw: (B, C, H, W) float32. Returns (B, C, H, W) float32."""
    B, C, H, W = x_nchw.shape
    N = H * W
    K = params["code_t"].shape[1]
    x_bcn = x_nchw.reshape(B, C, N)                # free reshape: N on lanes

    vmem_limit = _vmem_limit_bytes()
    budget = int(vmem_limit * 0.8)                 # headroom for Mosaic scratch

    const_args = (params["wp_fold"], params["bnb_col"], params["code_m2s"],
                  params["code_t"], params["scale_col"], params["sc2_col"],
                  params["bn1s_row"], params["bn1b_row"], params["wfc_bf"],
                  params["bfc_col"])
    const_shapes = [a.shape for a in const_args]
    # Constants are fetched once but (by default) double-buffered in VMEM.
    const_bytes = 2 * sum(a.dtype.itemsize * a.size for a in const_args)
    acc_bytes = 4 * C * _round_up_128(K)           # (C,K)+(1,K) scratch, lane-padded

    # ------------------------- fused single-pass path -------------------------
    per_col_fused = (4 * C * 4          # x + out blocks, double-buffered
                     + C * 4            # proj f32
                     + 2 * C * 2        # xb + pb bf16
                     + K * (3 * 4 + 2)) # s, e, a f32 + ab bf16
    fused_bytes = per_col_fused * N + const_bytes + acc_bytes + (2 << 20)
    use_fused = (not force_two_pass) and (tile_n is None) and fused_bytes <= budget

    if use_fused:
        def cmap1(shape):
            n = len(shape)
            return pl.BlockSpec(shape, lambda b: (0,) * n)

        out_bcn = pl.pallas_call(
            enc_fused_kernel,
            out_shape=jax.ShapeDtypeStruct((B, C, N), jnp.float32),
            grid_spec=pltpu.PrefetchScalarGridSpec(
                num_scalar_prefetch=0,
                grid=(B,),
                in_specs=[pl.BlockSpec((1, C, N), lambda b: (b, 0, 0))]
                         + [cmap1(s) for s in const_shapes],
                out_specs=pl.BlockSpec((1, C, N), lambda b: (b, 0, 0)),
            ),
            compiler_params=pltpu.CompilerParams(
                dimension_semantics=("parallel",),
                vmem_limit_bytes=vmem_limit),
        )(x_bcn, *const_args)
        return out_bcn.reshape(B, C, H, W)

    # ------------------------- two-pass fallback path -------------------------
    per_col_k1 = 2 * C * 4 + C * 4 + 2 * C * 2 + K * (3 * 4 + 2)
    fixed_k1 = const_bytes + acc_bytes + (2 << 20)
    if tile_n is not None:
        TN = int(tile_n)
        needs_mask = (N % TN != 0)
    else:
        TN, needs_mask = _pick_tile_n(N, per_col_k1, fixed_k1, budget)
    NT = pl.cdiv(N, TN)

    def cmap2(shape):
        n = len(shape)
        return pl.BlockSpec(shape, lambda b, t: (0,) * n)

    kernel1 = functools.partial(enc_gamma_kernel, n_valid=N, needs_mask=needs_mask)

    g1 = pl.pallas_call(
        kernel1,
        out_shape=jax.ShapeDtypeStruct((B, C, 1), jnp.float32),
        grid_spec=pltpu.PrefetchScalarGridSpec(
            num_scalar_prefetch=0,
            grid=(B, NT),
            in_specs=[pl.BlockSpec((1, C, TN), lambda b, t: (b, 0, t))]
                     + [cmap2(s) for s in const_shapes],
            out_specs=pl.BlockSpec((1, C, 1), lambda b, t: (b, 0, 0)),
            scratch_shapes=[pltpu.VMEM((C, K), jnp.float32),
                            pltpu.VMEM((1, K), jnp.float32)],
        ),
        compiler_params=pltpu.CompilerParams(
            dimension_semantics=("parallel", "arbitrary"),
            vmem_limit_bytes=vmem_limit),
    )(x_bcn, *const_args)

    # Phase 2: pure streaming; tile size decoupled from phase 1.
    per_col_k2 = 4 * C * 4                         # x + out, double-buffered
    TN2, _ = _pick_tile_n(N, per_col_k2, 1 << 20, budget)
    NT2 = pl.cdiv(N, TN2)

    out_bcn = pl.pallas_call(
        reweight_kernel,
        out_shape=jax.ShapeDtypeStruct((B, C, N), jnp.float32),
        grid_spec=pltpu.PrefetchScalarGridSpec(
            num_scalar_prefetch=0,
            grid=(B, NT2),
            in_specs=[pl.BlockSpec((1, C, TN2), lambda b, t: (b, 0, t)),
                      pl.BlockSpec((1, C, 1), lambda b, t: (b, 0, 0))],
            out_specs=pl.BlockSpec((1, C, TN2), lambda b, t: (b, 0, t)),
        ),
        compiler_params=pltpu.CompilerParams(
            dimension_semantics=("parallel", "parallel"),
            vmem_limit_bytes=vmem_limit),
    )(x_bcn, g1)

    return out_bcn.reshape(B, C, H, W)


# --------------------------------------------------------------------------- #
# Parameters (eval-mode module) and host-side folding
# --------------------------------------------------------------------------- #
def init_params(key, in_channels, num_codes):
    C, K = in_channels, num_codes
    ks = jax.random.split(key, 12)
    eps = 1e-5

    # 1x1 conv (no bias) + BN(C) running stats.
    wp = jax.random.normal(ks[0], (C, C), jnp.float32) / jnp.sqrt(C)     # (Cout, Cin)
    g = 1.0 + 0.1 * jax.random.normal(ks[1], (C,), jnp.float32)
    b = 0.1 * jax.random.normal(ks[2], (C,), jnp.float32)
    rm = 0.1 * jax.random.normal(ks[3], (C,), jnp.float32)
    rv = jnp.abs(jax.random.normal(ks[4], (C,), jnp.float32)) + 0.5
    bn_scale = g / jnp.sqrt(rv + eps)
    bn_bias = b - rm * bn_scale

    # Encoding: codewords ~ U(-std, std), scale ~ U(-1, 0)  (mmseg Encoding init)
    std = 1.0 / ((K * C) ** 0.5)
    codewords = jax.random.uniform(ks[5], (K, C), jnp.float32, -std, std)
    scale = jax.random.uniform(ks[6], (K,), jnp.float32, -1.0, 0.0)

    # BN1d over num_codes.
    g1 = 1.0 + 0.1 * jax.random.normal(ks[7], (K,), jnp.float32)
    b1 = 0.1 * jax.random.normal(ks[8], (K,), jnp.float32)
    rm1 = 0.1 * jax.random.normal(ks[9], (K,), jnp.float32)
    rv1 = jnp.abs(jax.random.normal(ks[10], (K,), jnp.float32)) + 0.5
    bn1_scale = g1 / jnp.sqrt(rv1 + eps)
    bn1_bias = b1 - rm1 * bn1_scale

    # fc: Linear(C, C).
    wfc = jax.random.normal(ks[11], (C, C), jnp.float32) / jnp.sqrt(C)   # (out, in)
    bfc = jnp.zeros((C,), jnp.float32)

    return dict(wp=wp, bn_scale=bn_scale, bn_bias=bn_bias, codewords=codewords,
                scale=scale, bn1_scale=bn1_scale, bn1_bias=bn1_bias,
                wfc=wfc, bfc=bfc)


def prepare_kernel_params(p):
    """Host-side folding / transposition / bf16 casts for the kernels."""
    code = p["codewords"]                                                # (K, C)
    c2 = jnp.sum(code * code, axis=-1)                                   # (K,)
    return dict(
        wp_fold=(p["bn_scale"][:, None] * p["wp"]).astype(jnp.bfloat16),   # (C, C)
        bnb_col=p["bn_bias"][:, None].astype(jnp.float32),                 # (C, 1)
        code_m2s=(-2.0 * p["scale"][:, None] * code).astype(jnp.bfloat16), # (K, C)
        code_t=code.T.astype(jnp.float32),                                 # (C, K)
        scale_col=p["scale"][:, None].astype(jnp.float32),                 # (K, 1)
        sc2_col=(p["scale"] * c2)[:, None].astype(jnp.float32),            # (K, 1)
        bn1s_row=p["bn1_scale"][None, :].astype(jnp.float32),              # (1, K)
        bn1b_row=p["bn1_bias"][None, :].astype(jnp.float32),               # (1, K)
        wfc_bf=p["wfc"].astype(jnp.bfloat16),                              # (C, C) (out,in)
        bfc_col=p["bfc"][:, None].astype(jnp.float32),                     # (C, 1)
    )


# --------------------------------------------------------------------------- #
# Pure-JAX reference (f32, direct (p - c)^2 form) for a sanity check
# --------------------------------------------------------------------------- #
def enc_module_reference(x_nchw, p):
    B, C, H, W = x_nchw.shape
    hp = lax.Precision.HIGHEST
    x = jnp.transpose(x_nchw, (0, 2, 3, 1)).reshape(B, H * W, C)          # (B, N, C)
    proj = jnp.einsum("bnc,oc->bno", x, p["wp"], precision=hp)
    proj = jnp.maximum(proj * p["bn_scale"] + p["bn_bias"], 0.0)
    diff = proj[:, :, None, :] - p["codewords"][None, None]               # (B, N, K, C)
    d = jnp.sum(diff * diff, axis=-1)                                     # (B, N, K)
    a = jax.nn.softmax(p["scale"][None, None, :] * d, axis=-1)
    enc = jnp.einsum("bnk,bnkc->bkc", a, diff, precision=hp)              # (B, K, C)
    enc = jnp.maximum(enc * p["bn1_scale"][None, :, None]
                      + p["bn1_bias"][None, :, None], 0.0)
    feat = enc.mean(axis=1)                                               # (B, C)
    gamma = jax.nn.sigmoid(
        jnp.einsum("bc,oc->bo", feat, p["wfc"], precision=hp) + p["bfc"])
    y = gamma[:, :, None, None]
    return jnp.maximum(x_nchw + x_nchw * y, 0.0)


if __name__ == "__main__":
    B, C, H, W = 2, 32, 16, 16
    K = 32  # num_codes

    key = jax.random.PRNGKey(0)
    kx, kp = jax.random.split(key)
    x = jax.random.normal(kx, (B, C, H, W), jnp.float32)

    raw = init_params(kp, C, K)
    params = prepare_kernel_params(raw)
    ref = enc_module_reference(x, raw)

    # Fused single-pass path (whole (C, N) row resident in VMEM).
    out_fused = enc_module_forward(x, params)
    jax.block_until_ready(out_fused)
    assert out_fused.shape == (B, C, H, W)
    err_f = float(jnp.max(jnp.abs(out_fused - ref)))
    assert jnp.allclose(out_fused, ref, rtol=5e-2, atol=5e-2), \
        f"fused path max abs err {err_f}"

    # Two-pass fallback path (tile_n=128 -> 2 N-tiles: exercises accumulate/finalize).
    out_2p = enc_module_forward(x, params, force_two_pass=True, tile_n=128)
    jax.block_until_ready(out_2p)
    err_2 = float(jnp.max(jnp.abs(out_2p - ref)))
    assert jnp.allclose(out_2p, ref, rtol=5e-2, atol=5e-2), \
        f"two-pass path max abs err {err_2}"

    print("KERNEL_OK")
</pallas_src>

<mosaic_0001>
module attributes {stable_mosaic.version = 11 : i64} {
  func.func @enc_fused_kernel(%arg0: i32, %arg1: memref<1x32x256xf32, #tpu.memory_space<vmem>>, %arg2: memref<32x32xbf16, #tpu.memory_space<vmem>>, %arg3: memref<32x1xf32, #tpu.memory_space<vmem>>, %arg4: memref<32x32xbf16, #tpu.memory_space<vmem>>, %arg5: memref<32x32xf32, #tpu.memory_space<vmem>>, %arg6: memref<32x1xf32, #tpu.memory_space<vmem>>, %arg7: memref<32x1xf32, #tpu.memory_space<vmem>>, %arg8: memref<1x32xf32, #tpu.memory_space<vmem>>, %arg9: memref<1x32xf32, #tpu.memory_space<vmem>>, %arg10: memref<32x32xbf16, #tpu.memory_space<vmem>>, %arg11: memref<32x1xf32, #tpu.memory_space<vmem>>, %arg12: memref<1x32x256xf32, #tpu.memory_space<vmem>>) attributes {dimension_semantics = [#tpu.dimension_semantics<parallel>], iteration_bounds = array<i64: 2>, scalar_prefetch = 0 : i64, scratch_operands = 0 : i64, tpu.core_type = #tpu.core_type<tc>, window_params = [{transform_indices = @transform_0, window_bounds = array<i64: 1, 32, 256>}, {pipeline_mode = #tpu.pipeline_mode<synchronous>, transform_indices = @transform_1, window_bounds = array<i64: 32, 32>}, {pipeline_mode = #tpu.pipeline_mode<synchronous>, transform_indices = @transform_2, window_bounds = array<i64: 32, 1>}, {pipeline_mode = #tpu.pipeline_mode<synchronous>, transform_indices = @transform_3, window_bounds = array<i64: 32, 32>}, {pipeline_mode = #tpu.pipeline_mode<synchronous>, transform_indices = @transform_4, window_bounds = array<i64: 32, 32>}, {pipeline_mode = #tpu.pipeline_mode<synchronous>, transform_indices = @transform_5, window_bounds = array<i64: 32, 1>}, {pipeline_mode = #tpu.pipeline_mode<synchronous>, transform_indices = @transform_6, window_bounds = array<i64: 32, 1>}, {pipeline_mode = #tpu.pipeline_mode<synchronous>, transform_indices = @transform_7, window_bounds = array<i64: 1, 32>}, {pipeline_mode = #tpu.pipeline_mode<synchronous>, transform_indices = @transform_8, window_bounds = array<i64: 1, 32>}, {pipeline_mode = #tpu.pipeline_mode<synchronous>, transform_indices = @transform_9, window_bounds = array<i64: 32, 32>}, {pipeline_mode = #tpu.pipeline_mode<synchronous>, transform_indices = @transform_10, window_bounds = array<i64: 32, 1>}, {transform_indices = @transform_11, window_bounds = array<i64: 1, 32, 256>}]} {
    %c0 = arith.constant 0 : index
    %c0_0 = arith.constant 0 : index
    %c0_1 = arith.constant 0 : index
    %0 = vector.load %arg1[%c0, %c0_0, %c0_1] : memref<1x32x256xf32, #tpu.memory_space<vmem>>, vector<1x32x256xf32>
    %1 = vector.shape_cast %0 : vector<1x32x256xf32> to vector<32x256xf32>
    %2 = arith.truncf %1 : vector<32x256xf32> to vector<32x256xbf16>
    %c0_2 = arith.constant 0 : index
    %c0_3 = arith.constant 0 : index
    %3 = vector.load %arg2[%c0_2, %c0_3] : memref<32x32xbf16, #tpu.memory_space<vmem>>, vector<32x32xbf16>
    %cst = arith.constant dense<0.000000e+00> : vector<32x256xf32>
    %4 = tpu.matmul %3, %2, %cst {dimension_numbers = #tpu.dot_dimension_numbers<[1], [0], [0], [1], [0, 0, 1, 1], [], []>} : vector<32x32xbf16>, vector<32x256xbf16>, vector<32x256xf32> -> vector<32x256xf32>
    %c0_4 = arith.constant 0 : index
    %c0_5 = arith.constant 0 : index
    %5 = vector.load %arg3[%c0_4, %c0_5] : memref<32x1xf32, #tpu.memory_space<vmem>>, vector<32x1xf32>
    %6 = vector.broadcast %5 : vector<32x1xf32> to vector<32x256xf32>
    %7 = arith.addf %4, %6 : vector<32x256xf32>
    %cst_6 = arith.constant 0.000000e+00 : f32
    %8 = vector.broadcast %cst_6 : f32 to vector<32x256xf32>
    %9 = arith.maximumf %7, %8 : vector<32x256xf32>
    %10 = arith.truncf %9 : vector<32x256xf32> to vector<32x256xbf16>
    %11 = arith.mulf %9, %9 : vector<32x256xf32>
    %cst_7 = arith.constant dense<0.000000e+00> : vector<256xf32>
    %12 = vector.multi_reduction <add>, %11, %cst_7 [0] : vector<32x256xf32> to vector<256xf32>
    %13 = vector.shape_cast %12 : vector<256xf32> to vector<1x256xf32>
    %c0_8 = arith.constant 0 : index
    %c0_9 = arith.constant 0 : index
    %14 = vector.load %arg4[%c0_8, %c0_9] : memref<32x32xbf16, #tpu.memory_space<vmem>>, vector<32x32xbf16>
    %cst_10 = arith.constant dense<0.000000e+00> : vector<32x256xf32>
    %15 = tpu.matmul %14, %10, %cst_10 {dimension_numbers = #tpu.dot_dimension_numbers<[1], [0], [0], [1], [0, 0, 1, 1], [], []>} : vector<32x32xbf16>, vector<32x256xbf16>, vector<32x256xf32> -> vector<32x256xf32>
    %c0_11 = arith.constant 0 : index
    %c0_12 = arith.constant 0 : index
    %16 = vector.load %arg6[%c0_11, %c0_12] : memref<32x1xf32, #tpu.memory_space<vmem>>, vector<32x1xf32>
    %17 = vector.broadcast %16 : vector<32x1xf32> to vector<32x256xf32>
    %18 = vector.broadcast %13 : vector<1x256xf32> to vector<32x256xf32>
    %19 = arith.mulf %17, %18 : vector<32x256xf32>
    %c0_13 = arith.constant 0 : index
    %c0_14 = arith.constant 0 : index
    %20 = vector.load %arg7[%c0_13, %c0_14] : memref<32x1xf32, #tpu.memory_space<vmem>>, vector<32x1xf32>
    %21 = vector.broadcast %20 : vector<32x1xf32> to vector<32x256xf32>
    %22 = arith.addf %19, %21 : vector<32x256xf32>
    %23 = arith.addf %22, %15 : vector<32x256xf32>
    %cst_15 = arith.constant dense<0xFF800000> : vector<256xf32>
    %24 = vector.multi_reduction <maximumf>, %23, %cst_15 [0] : vector<32x256xf32> to vector<256xf32>
    %25 = vector.shape_cast %24 : vector<256xf32> to vector<1x256xf32>
    %26 = vector.broadcast %25 : vector<1x256xf32> to vector<32x256xf32>
    %27 = arith.subf %23, %26 : vector<32x256xf32>
    %28 = math.exp %27 : vector<32x256xf32>
    %cst_16 = arith.constant dense<0.000000e+00> : vector<256xf32>
    %29 = vector.multi_reduction <add>, %28, %cst_16 [0] : vector<32x256xf32> to vector<256xf32>
    %30 = vector.shape_cast %29 : vector<256xf32> to vector<1x256xf32>
    %31 = tpu.reciprocal %30 {approx = true} : vector<1x256xf32> -> vector<1x256xf32>
    %32 = vector.broadcast %31 : vector<1x256xf32> to vector<32x256xf32>
    %33 = arith.mulf %28, %32 : vector<32x256xf32>
    %34 = arith.truncf %33 : vector<32x256xf32> to vector<32x256xbf16>
    %cst_17 = arith.constant dense<0.000000e+00> : vector<32x32xf32>
    %35 = tpu.matmul %10, %34, %cst_17 {dimension_numbers = #tpu.dot_dimension_numbers<[1], [1], [0], [0], [0, 0, 1, 0], [], []>} : vector<32x256xbf16>, vector<32x256xbf16>, vector<32x32xf32> -> vector<32x32xf32>
    %cst_18 = arith.constant 1.000000e+00 : bf16
    %36 = vector.broadcast %cst_18 : bf16 to vector<1x256xbf16>
    %cst_19 = arith.constant dense<0.000000e+00> : vector<1x32xf32>
    %37 = tpu.matmul %36, %34, %cst_19 {dimension_numbers = #tpu.dot_dimension_numbers<[1], [1], [0], [0], [0, 0, 1, 0], [], []>} : vector<1x256xbf16>, vector<32x256xbf16>, vector<1x32xf32> -> vector<1x32xf32>
    %c0_20 = arith.constant 0 : index
    %c0_21 = arith.constant 0 : index
    %38 = vector.load %arg5[%c0_20, %c0_21] : memref<32x32xf32, #tpu.memory_space<vmem>>, vector<32x32xf32>
    %39 = vector.broadcast %37 : vector<1x32xf32> to vector<32x32xf32>
    %40 = arith.mulf %39, %38 : vector<32x32xf32>
    %41 = arith.subf %35, %40 : vector<32x32xf32>
    %c0_22 = arith.constant 0 : index
    %c0_23 = arith.constant 0 : index
    %42 = vector.load %arg8[%c0_22, %c0_23] : memref<1x32xf32, #tpu.memory_space<vmem>>, vector<1x32xf32>
    %43 = vector.broadcast %42 : vector<1x32xf32> to vector<32x32xf32>
    %44 = arith.mulf %41, %43 : vector<32x32xf32>
    %c0_24 = arith.constant 0 : index
    %c0_25 = arith.constant 0 : index
    %45 = vector.load %arg9[%c0_24, %c0_25] : memref<1x32xf32, #tpu.memory_space<vmem>>, vector<1x32xf32>
    %46 = vector.broadcast %45 : vector<1x32xf32> to vector<32x32xf32>
    %47 = arith.addf %44, %46 : vector<32x32xf32>
    %cst_26 = arith.constant 0.000000e+00 : f32
    %48 = vector.broadcast %cst_26 : f32 to vector<32x32xf32>
    %49 = arith.maximumf %47, %48 : vector<32x32xf32>
    %cst_27 = arith.constant dense<0.000000e+00> : vector<32xf32>
    %50 = vector.multi_reduction <add>, %49, %cst_27 [1] : vector<32x32xf32> to vector<32xf32>
    %51 = vector.shape_cast %50 : vector<32xf32> to vector<32x1xf32>
    %cst_28 = arith.constant 3.200000e+01 : f32
    %52 = vector.broadcast %cst_28 : f32 to vector<32x1xf32>
    %53 = arith.divf %51, %52 : vector<32x1xf32>
    %c0_29 = arith.constant 0 : index
    %c0_30 = arith.constant 0 : index
    %54 = vector.load %arg10[%c0_29, %c0_30] : memref<32x32xbf16, #tpu.memory_space<vmem>>, vector<32x32xbf16>
    %55 = arith.truncf %53 : vector<32x1xf32> to vector<32x1xbf16>
    %cst_31 = arith.constant dense<0.000000e+00> : vector<32x1xf32>
    %56 = tpu.matmul %54, %55, %cst_31 {dimension_numbers = #tpu.dot_dimension_numbers<[1], [0], [0], [1], [0, 0, 1, 1], [], []>} : vector<32x32xbf16>, vector<32x1xbf16>, vector<32x1xf32> -> vector<32x1xf32>
    %c0_32 = arith.constant 0 : index
    %c0_33 = arith.constant 0 : index
    %57 = vector.load %arg11[%c0_32, %c0_33] : memref<32x1xf32, #tpu.memory_space<vmem>>, vector<32x1xf32>
    %58 = arith.addf %56, %57 : vector<32x1xf32>
    %cst_34 = arith.constant 0.000000e+00 : f32
    %59 = vector.broadcast %cst_34 : f32 to vector<32x1xf32>
    %60 = arith.subf %59, %58 : vector<32x1xf32>
    %61 = math.exp %60 : vector<32x1xf32>
    %cst_35 = arith.constant 1.000000e+00 : f32
    %62 = vector.broadcast %cst_35 : f32 to vector<32x1xf32>
    %63 = arith.addf %62, %61 : vector<32x1xf32>
    %cst_36 = arith.constant 1.000000e+00 : f32
    %64 = vector.broadcast %cst_36 : f32 to vector<32x1xf32>
    %65 = arith.divf %64, %63 : vector<32x1xf32>
    %cst_37 = arith.constant 1.000000e+00 : f32
    %66 = vector.broadcast %cst_37 : f32 to vector<32x1xf32>
    %67 = arith.addf %66, %65 : vector<32x1xf32>
    %68 = vector.broadcast %67 : vector<32x1xf32> to vector<32x256xf32>
    %69 = arith.mulf %1, %68 : vector<32x256xf32>
    %cst_38 = arith.constant 0.000000e+00 : f32
    %70 = vector.broadcast %cst_38 : f32 to vector<32x256xf32>
    %71 = arith.maximumf %69, %70 : vector<32x256xf32>
    %c0_39 = arith.constant 0 : index
    %c0_40 = arith.constant 0 : index
    %c0_41 = arith.constant 0 : index
    %72 = vector.load %arg12[%c0_39, %c0_40, %c0_41] : memref<1x32x256xf32, #tpu.memory_space<vmem>>, vector<1x32x256xf32>
    %73 = vector.shape_cast %72 : vector<1x32x256xf32> to vector<32x256xf32>
    %74 = vector.shape_cast %71 : vector<32x256xf32> to vector<1x32x256xf32>
    tpu.vector_store %arg12[%c0_39, %c0_40, %c0_41], %74 {strides = array<i32>} : memref<1x32x256xf32, #tpu.memory_space<vmem>>, vector<1x32x256xf32>,
    return
  }
  func.func @transform_0(%arg0: i32) -> (i32, i32, i32) {
    %c0_i32 = arith.constant 0 : i32
    %c0_i32_0 = arith.constant 0 : i32
    %c0_i32_1 = arith.constant 0 : i32
    return %arg0, %c0_i32, %c0_i32_0 : i32, i32, i32
  }
  func.func @transform_1(%arg0: i32) -> (i32, i32) {
    %c0_i32 = arith.constant 0 : i32
    %c0_i32_0 = arith.constant 0 : i32
    %c0_i32_1 = arith.constant 0 : i32
    return %c0_i32, %c0_i32_0 : i32, i32
  }
  func.func @transform_2(%arg0: i32) -> (i32, i32) {
    %c0_i32 = arith.constant 0 : i32
    %c0_i32_0 = arith.constant 0 : i32
    %c0_i32_1 = arith.constant 0 : i32
    return %c0_i32, %c0_i32_0 : i32, i32
  }
  func.func @transform_3(%arg0: i32) -> (i32, i32) {
    %c0_i32 = arith.constant 0 : i32
    %c0_i32_0 = arith.constant 0 : i32
    %c0_i32_1 = arith.constant 0 : i32
    return %c0_i32, %c0_i32_0 : i32, i32
  }
  func.func @transform_4(%arg0: i32) -> (i32, i32) {
    %c0_i32 = arith.constant 0 : i32
    %c0_i32_0 = arith.constant 0 : i32
    %c0_i32_1 = arith.constant 0 : i32
    return %c0_i32, %c0_i32_0 : i32, i32
  }
  func.func @transform_5(%arg0: i32) -> (i32, i32) {
    %c0_i32 = arith.constant 0 : i32
    %c0_i32_0 = arith.constant 0 : i32
    %c0_i32_1 = arith.constant 0 : i32
    return %c0_i32, %c0_i32_0 : i32, i32
  }
  func.func @transform_6(%arg0: i32) -> (i32, i32) {
    %c0_i32 = arith.constant 0 : i32
    %c0_i32_0 = arith.constant 0 : i32
    %c0_i32_1 = arith.constant 0 : i32
    return %c0_i32, %c0_i32_0 : i32, i32
  }
  func.func @transform_7(%arg0: i32) -> (i32, i32) {
    %c0_i32 = arith.constant 0 : i32
    %c0_i32_0 = arith.constant 0 : i32
    %c0_i32_1 = arith.constant 0 : i32
    return %c0_i32, %c0_i32_0 : i32, i32
  }
  func.func @transform_8(%arg0: i32) -> (i32, i32) {
    %c0_i32 = arith.constant 0 : i32
    %c0_i32_0 = arith.constant 0 : i32
    %c0_i32_1 = arith.constant 0 : i32
    return %c0_i32, %c0_i32_0 : i32, i32
  }
  func.func @transform_9(%arg0: i32) -> (i32, i32) {
    %c0_i32 = arith.constant 0 : i32
    %c0_i32_0 = arith.constant 0 : i32
    %c0_i32_1 = arith.constant 0 : i32
    return %c0_i32, %c0_i32_0 : i32, i32
  }
  func.func @transform_10(%arg0: i32) -> (i32, i32) {
    %c0_i32 = arith.constant 0 : i32
    %c0_i32_0 = arith.constant 0 : i32
    %c0_i32_1 = arith.constant 0 : i32
    return %c0_i32, %c0_i32_0 : i32, i32
  }
  func.func @transform_11(%arg0: i32) -> (i32, i32, i32) {
    %c0_i32 = arith.constant 0 : i32
    %c0_i32_0 = arith.constant 0 : i32
    %c0_i32_1 = arith.constant 0 : i32
    return %arg0, %c0_i32, %c0_i32_0 : i32, i32, i32
  }
}

</mosaic_0001>

<bundles_post_ra>
// kernel: tpu_custom_call.1
= control target key start
LH: loop header
LB: loop body
LE: loop exit
PB: predicated region body
PF: predicated region fallthrough
CT: control target
= control target key end

     0   :  { %s1925_s0 = inlined_call_operand.vmem [shape: f32[2,32,256], index: 0, kind: input, shape index: {}]   ;;  %s1926_s1 = inlined_call_operand.hbm [shape: bf16[32,32], index: 1, kind: input, shape index: {}]   ;;  %s1927_s2 = inlined_call_operand.vmem [shape: f32[32,1], index: 2, kind: input, shape index: {}]   ;;  %s1928_s3 = inlined_call_operand.hbm [shape: bf16[32,32], index: 3, kind: input, shape index: {}]   ;;  %s1929_s4 = inlined_call_operand.hbm [shape: f32[32,32], index: 4, kind: input, shape index: {}]   ;;  %s1930_s5 = inlined_call_operand.vmem [shape: f32[32,1], index: 5, kind: input, shape index: {}]   ;;  %s1931_s6 = inlined_call_operand.vmem [shape: f32[32,1], index: 6, kind: input, shape index: {}]   ;;  %s1932_s7 = inlined_call_operand.vmem [shape: f32[1,32], index: 7, kind: input, shape index: {}]   ;;  %s1933_s8 = inlined_call_operand.vmem [shape: f32[1,32], index: 8, kind: input, shape index: {}]   ;;  %s1934_s9 = inlined_call_operand.vmem [shape: bf16[32,32], index: 9, kind: input, shape index: {}]   ;;  %s1935_s10 = inlined_call_operand.vmem [shape: f32[32,1], index: 10, kind: input, shape index: {}]   ;;  %s1936_s11 = inlined_call_operand.hbm [shape: f32[2,32,256], index: 11, kind: output, shape index: {}]  }
   0x1   :  { %1947 = sst [smem:[#allocation18_spill]] %s1936_s11 }
   0x2   :  { %16 = vsyncpa [#allocation3], 0 }
   0x3   :  { %17 = vsyncpa [#allocation6], 0 }
   0x4   :  { %18 = vsyncpa [#allocation4], 0 }
   0x5   :  { %20 = vsyncpa [#allocation4 + $0x1], 0  ;;  %s1596_s17 = smov 0   ;;  %s1598_s18 = smov 0  }
   0x6   :  { %s1600_s19 = smov 0   ;;  %s1602_s20 = smov 0  }
   0x7 LB: > { %1948 = sst [smem:[#allocation12_spill]] %s1510_s17  ;;  %s1617_s21 = sadd.s32 4294967295, %s1522_s20   ;;  %s1522_s20 = sphi %s1602_s20, %s1970_s20   ;;  %s1518_s19 = sphi %s1600_s19, %s1972_s19   ;;  %s1514_s18 = sphi %s1598_s18, %s1974_s18   ;;  %s1510_s17 = sphi %s1596_s17, %s1973_s17  }
   0x8   : > { %1949 = sst [smem:[#allocation13_spill]] %s1518_s19  ;;  %s1200_s22 = sadd.s32 4294967294, %s1522_s20  }
   0x9   : > { %1950 = sst [smem:[#allocation14_spill]] %s1522_s20  ;;  %s1621_s23 = sadd.s32 1, %s1522_s20  }
   0xa   : > { %1951 = sst [smem:[#allocation15_spill]] %s1621_s23  ;;  %s269_s24 = sadd.s32 1, %s1518_s19 }
   0xb   : > { %s266_s25 = ssub.s32 %s1522_s20, %s1621_s23  ;;  %p279_p0 = scmp.ne.s32.totalorder %s1518_s19, %s1514_s18 }
   0xc   : > { %p267_p1 = scmp.eq.s32.totalorder %s266_s25, 0  ;;  %p280_p2 = scmp.eq.s32.totalorder %s1617_s21, 1 }
   0xd   : > { %p285_p3 = scmp.ne.s32.totalorder %s1514_s18, %s1510_s17  ;;  %p286_p4 = scmp.eq.s32.totalorder %s1200_s22, 1 }
   0xe   : > { %s1632_s26 = scalar_select %p267_p1, %s1518_s19, %s269_s24  }
   0xf   : > { %p1634_p5 = por %p280_p2, %p279_p0  ;;  %p1638_p6 = por %p286_p4, %p285_p3 }
  0x10   : > { %1952 = sst [smem:[#allocation16_spill]] %s1632_s26  ;;  %p1201_p7 = scmp.ge.s32.totalorder %s1522_s20, 1 }
  0x11   : > { %s1953_s27 = scalar_select %p1634_p5, 1, 0 }
  0x12   : > { %s1954_s28 = scalar_select %p1638_p6, 1, 0 }
  0x13   : > { %p293_p8 = scmp.lt.s32.totalorder %s1522_s20, 3  ;;  %p1940_p9 = scmp.eq.s32.totalorder %s1617_s21, 0 }
  0x14   : > { %1955 = sst [smem:[#allocation17_spill]] %s1954_s28  ;;  %s1524_s30 = smov [#allocation5]  }
  0x15   : > { %p1645_p10 = pnand %p1201_p7, %p293_p8  ;;  %s321_s12 = sshll.u32 %s1524_s30, 4  ;;  %s1651_s12 = int_to_ptr.vmem [resolvable:$true] %s321_s12 }
  0x16   : > { %s1525_s14 = smov [#allocation2]   ;;  %s1526_s16 = smov [#allocation7]  }
  0x17   : > { %s1956_s29 = scalar_select %p1645_p10, 1, 0 }
  0x18   : > { %p1260_p11 = pneg %p1645_p10  ;;  %s305_s15 = sshll.u32 %s1525_s14, 4  ;;  %s1659_s15 = int_to_ptr.vmem [resolvable:$true] %s305_s15 }
  0x19   : > { %s1661_s22 = sshll.u32 %s1526_s16, 4  ;;  %s1368_s26 = scalar_lea.hbm %s1928_s3, 256  ;;  %s335_s22 = int_to_ptr.vmem [resolvable:$true] %s1661_s22 }
  0x1a   : > { %p1655_p12 = pnand %p1940_p9, %p1260_p11  ;;  %p1369_p13 = scmp.ne.s32.totalorder %s1928_s3, %s1368_s26 }
  0x1b   : > { %p1375_p3 = scmp.lt.u32.totalorder %s1368_s26, %s1928_s3 }
  0x1c   : > { %p1671_p0 = pneg %p1655_p12 }
  0x1e   : > { %p1371_p1 = pnand %p1671_p0, %p1369_p13 }
  0x20   : > { %p1372_p2 = pneg %p1371_p1 }
  0x22   : > { %p1377_p4 = pnand %p1375_p3, %p1372_p2 }
  0x24   : > { %1380 = shalt.err (!%p1377_p4)
}
  0x25   : > { %s1381_s19 = scalar_lea.vmem %s1651_s12, 256  ;;  %p1389_p9 = scmp.lt.s32.totalorder %s1651_s12, %s1651_s12 }
  0x26   : > { %p1382_p7 = scmp.ne.s32.totalorder %s1651_s12, %s1381_s19  ;;  %p1390_p6 = scmp.lt.s32.totalorder %s1381_s19, %s1381_s19 }
  0x28   : > { %p1384_p8 = pnand %p1382_p7, %p1671_p0  ;;  %p1391_p13 = por %p1390_p6, %p1389_p9 }
  0x2a   : > { %p1385_p11 = pneg %p1384_p8 }
  0x2c   : > { %p1392_p1 = pnand %p1391_p13, %p1385_p11 }
  0x2e   : > { %1395 = shalt.err (!%p1392_p1)
}
  0x2f   : > { %s1527_s24 = smov 64   ;;  %s1528_s26 = smov 4  }
  0x30   : > { %1266 = dma.hbm_to_vmem [thread:$0]  (!%p1655_p12), %s1928_s3, 256, %s1651_s12, [#allocation6], %s1527_s24, %s1527_s24, %s1528_s26  }
  0x31   : > { %s1396_s28 = scalar_lea.hbm %s1926_s1, 256 }
  0x32   : > { %p1397_p6 = scmp.ne.s32.totalorder %s1926_s1, %s1396_s28  ;;  %p1403_p3 = scmp.lt.u32.totalorder %s1396_s28, %s1926_s1 }
  0x34   : > { %p1399_p9 = pnand %p1397_p6, %p1671_p0 }
  0x36   : > { %p1400_p2 = pneg %p1399_p9 }
  0x38   : > { %p1405_p4 = pnand %p1403_p3, %p1400_p2 }
  0x3a   : > { %1408 = shalt.err (!%p1405_p4)
}
  0x3b   : > { %s1409_s12 = scalar_lea.vmem %s1659_s15, 256  ;;  %p1417_p13 = scmp.lt.s32.totalorder %s1659_s15, %s1659_s15 }
  0x3c   : > { %p1410_p7 = scmp.ne.s32.totalorder %s1659_s15, %s1409_s12  ;;  %p1418_p1 = scmp.lt.s32.totalorder %s1409_s12, %s1409_s12 }
  0x3e   : > { %p1412_p8 = pnand %p1410_p7, %p1671_p0  ;;  %p1419_p6 = por %p1418_p1, %p1417_p13 }
  0x40   : > { %p1413_p11 = pneg %p1412_p8 }
  0x42   : > { %p1420_p9 = pnand %p1419_p6, %p1413_p11 }
  0x44   : > { %1423 = shalt.err (!%p1420_p9)
}
  0x45   : > { %1263 = dma.hbm_to_vmem [thread:$0]  (!%p1655_p12), %s1926_s1, 256, %s1659_s15, [#allocation3], %s1527_s24, %s1527_s24, %s1528_s26  }
  0x46   : > { %s1424_s25 = scalar_lea.hbm %s1929_s4, 512 }
  0x47   : > { %p1425_p2 = scmp.ne.s32.totalorder %s1929_s4, %s1424_s25  ;;  %p1431_p7 = scmp.lt.u32.totalorder %s1424_s25, %s1929_s4 }
  0x49   : > { %p1427_p3 = pnand %p1425_p2, %p1671_p0 }
  0x4b   : > { %p1428_p4 = pneg %p1427_p3 }
  0x4d   : > { %p1433_p8 = pnand %p1431_p7, %p1428_p4 }
  0x4f   : > { %1436 = shalt.err (!%p1433_p8)
}
  0x50   : > { %s1437_s12 = scalar_lea.vmem %s335_s22, 512  ;;  %p1445_p6 = scmp.lt.s32.totalorder %s335_s22, %s335_s22 }
  0x51   : > { %p1438_p11 = scmp.ne.s32.totalorder %s335_s22, %s1437_s12  ;;  %p1446_p9 = scmp.lt.s32.totalorder %s1437_s12, %s1437_s12 }
  0x53   : > { %p1440_p13 = pnand %p1438_p11, %p1671_p0  ;;  %p1447_p5 = por %p1446_p9, %p1445_p6 }
  0x55   : > { %p1441_p1 = pneg %p1440_p13 }
  0x57   : > { %p1448_p10 = pnand %p1447_p5, %p1441_p1 }
  0x59   : > { %1451 = shalt.err (!%p1448_p10)
}
  0x5a   : > { %s1529_s15 = smov 128   ;;  %s1530_s24 = smov 8  }
  0x5b   : > { %1269 = dma.hbm_to_vmem [thread:$0]  (!%p1655_p12), %s1929_s4, 512, %s335_s22, [#allocation6], %s1529_s15, %s1529_s15, %s1530_s24  }
  0x5c   : > { %p1959_p2 = scmp.ne.s32.totalorder %s1956_s29, 0 }
  0x5d   : > { %p1960_p3 = scmp.eq.s32.totalorder (!%p1959_p2), %s1617_s21, 0 }
  0x5e   : > { %376 = sbr.rel (%p1959_p2) target bundleno = 1448 (0x5a8), region = 64 }
  0x65   : > { %1497 = dma.done.wait (%p1960_p3), [#allocation3], 256   ;;  %p1961_p0 = pmov %p1960_p3 }
  0x67   : > { %1499 = vsyncadd (%p1961_p0), [#allocation3], 4294967040  ;;  %p1962_p5 = pmov %p1961_p0 }
  0x68   : > { %p1963_p10 = pmov %p1961_p0 }
  0x69   : > { %1501 = dma.done.wait (%p1962_p5), [#allocation6], 768  }
  0x6a   : > { %1503 = vsyncadd (%p1963_p10), [#allocation6], 4294966528  ;;  %p424_p4 = scmp.lt.s32.totalorder %s1617_s21, 1  ;;  %v1531_v0 = vmov 0   ;;  %v447_v13 = vld [vmem:[%s1927_s2] sm:$0xff]  ;;  %v449_v14 = vld [vmem:[%s1927_s2 + $0x10] sm:$0xff] }
  0x6b   : > { %520 = vmatprep.mubr.bf16.mxu0 %v1531_v0  ;;  %1324 = vset.pattern.permute.xlu0 %v1531_v0  ;;  %v448_v15 = vld [vmem:[%s1927_s2 + $0x8] sm:$0xff]  ;;  %v1326_v16 = vld [vmem:[#allocation2] sm:$0xff]   ;;  %v450_v17 = vld [vmem:[%s1927_s2 + $0x18] sm:$0xff]  ;;  %vm481_vm0 = vcmask 261120   ;;  %s421_s19 = sand.u32 1, %s1514_s18   ;;  %s1233_s26 = sshll.u32 %s1617_s21, 10 }
  0x6c   : > { %s425_s23 = scalar_select %p424_p4, %s1617_s21, 1  ;;  %1325 = vset.pattern.permute.xlu1 %v1531_v0  ;;  %631 = vmatprep.mubr.bf16.mxu1 %v1531_v0  ;;  %v652_v18 = vld [vmem:[%s1930_s5] sm:$0xff]  ;;  %v653_v19 = vld [vmem:[%s1930_s5 + $0x8] sm:$0xff]  ;;  %v654_v20 = vld [vmem:[%s1930_s5 + $0x10] sm:$0xff] }
  0x6d   : > { %453 = vperm.xlu0 %1324, %v447_v13   ;;  %463 = vperm.xlu1 %1325, %v449_v14   ;;  %v1327_v21 = vld [vmem:[#allocation2 + $0x8] sm:$0xff]   ;;  %v655_v22 = vld [vmem:[%s1930_s5 + $0x18] sm:$0xff]  ;;  %v684_v23 = vld [vmem:[%s1931_s6] sm:$0xff]  ;;  %s1210_s12 = sshll.u32 %s421_s19, 6  ;;  %s1884_s21 = scalar_lea.sflag [#allocation4], %s421_s19 }
  0x6e   : > { %s1232_s29 = sshll.u32 %s425_s23, 6  ;;  %v685_v24 = vld [vmem:[%s1931_s6 + $0x8] sm:$0xff]  ;;  %v686_v25 = vld [vmem:[%s1931_s6 + $0x10] sm:$0xff]  ;;  %v687_v26 = vld [vmem:[%s1931_s6 + $0x18] sm:$0xff]  ;;  %s423_s15 = scalar_lea.vmem [#allocation8], %s1210_s12 }
  0x6f   : > { %s428_s17 = scalar_lea.vmem %s1925_s0, %s1232_s29  ;;  %s1107_s24 = sshll.u32 %s423_s15, 4  ;;  %s1875_s24 = int_to_ptr.vmem [resolvable:$true] %s1107_s24 }
  0x70   : > { %v1753_v1 = vld [vmem:[%s428_s17 + $0x8] sm:$0xff]  ;;  %v1755_v2 = vld [vmem:[%s428_s17 + $0x18] sm:$0xff]  ;;  %v1757_v3 = vld [vmem:[%s428_s17] sm:$0xff]  ;;  %s1964_s29 = sld [smem:[#allocation18_spill]]  ;;  %s1452_s22 = scalar_lea.vmem %s1875_s24, 1024 }
  0x71   : > { %v440_v4 = vpack.c.bf16 %v1755_v2, %v1753_v1  ;;  %v1761_v5 = vld [vmem:[%s428_s17 + $0x10] sm:$0xff]  ;;  %v1763_v6 = vld [vmem:[%s428_s17 + $0x28] sm:$0xff]  ;;  %v1765_v7 = vld [vmem:[%s428_s17 + $0x38] sm:$0xff]  ;;  %458 = vperm.xlu0 %1324, %v448_v15   ;;  %468 = vperm.xlu1 %1325, %v450_v17   ;;  %p1453_p12 = scmp.ne.s32.totalorder %s1875_s24, %s1452_s22  ;;  %p1965_p7 = scmp.ne.s32.totalorder %s1953_s27, 0 }
  0x72   : > { %v439_v8 = vpack.c.bf16 %v1761_v5, %v1757_v3  ;;  %v442_v9 = vpack.c.bf16 %v1765_v7, %v1763_v6  ;;  %v1771_v10 = vld [vmem:[%s428_s17 + $0x20] sm:$0xff]  ;;  %v1773_v11 = vld [vmem:[%s428_s17 + $0x30] sm:$0xff]  ;;  %s1533_s17 = smov [#allocation8]  }
  0x73   : > { %488 = vmatprep.subr.bf16.mxu0 %v440_v4  ;;  %v441_v12 = vpack.c.bf16 %v1773_v11, %v1771_v10  ;;  %p1454_p8 = pnand %p1453_p12, %p1965_p7  ;;  %s1456_s20 = sshll.u32 %s1533_s17, 4  ;;  %s1457_s20 = int_to_ptr.vmem [resolvable:$false] %s1456_s20 }
  0x74   : > { %489 = vmatpush1.bf16.msra.mxu0 %v439_v8  ;;  %s1458_s28 = scalar_lea.vmem %s1457_s20, 2048  ;;  %p1459_p13 = scmp.lt.s32.totalorder %s1875_s24, %s1457_s20 }
  0x75   : > { %490 = vmatprep.subr.bf16.mxu0 %v442_v9  ;;  %658 = vperm.xlu0 %1324, %v652_v18   ;;  %v1328_v18 = vld [vmem:[#allocation5] sm:$0xff]   ;;  %p1455_p11 = pneg %p1454_p8  ;;  %p1460_p1 = scmp.lt.s32.totalorder %s1458_s28, %s1452_s22 }
  0x76   : > { %663 = vperm.xlu1 %1325, %v653_v19   ;;  %v1329_v19 = vld [vmem:[#allocation5 + $0x8] sm:$0xff]   ;;  %s1880_s13 = scalar_lea.hbm %s1964_s29, %s1233_s26 }
  0x77   : > { %p1461_p6 = por %p1460_p1, %p1459_p13 }
  0x78   : > { %491 = vmatpush1.bf16.msra.mxu0 %v441_v12 }
  0x79   : > { %668 = vperm.xlu0 %1324, %v654_v20   ;;  %v1532_v20 = vmov 1065369472   ;;  %p1462_p9 = pnand %p1461_p6, %p1455_p11 }
  0x7a   : > { %673 = vperm.xlu1 %1325, %v655_v22  }
  0x7b   : > { %1215 = vmatmul.mubr.msk.bf16.vlgmr.msra.gmra.mrb[0].mxu0 %vm481_vm0, %v1326_v16 }
  0x7c   : > { %530 = vmatprep.mubr.bf16.mxu0 %v1531_v0 }
  0x7d   : > { %690 = vperm.xlu0 %1324, %v684_v23  }
  0x7e   : > { %695 = vperm.xlu1 %1325, %v685_v24  }
  0x81   : > { %700 = vperm.xlu0 %1324, %v686_v25  }
  0x82   : > { %705 = vperm.xlu1 %1325, %v687_v26  }
  0x83   : > { %1216 = vmatmul.mubr.msk.bf16.gmra.mrb[4].mxu0 %vm481_vm0, %v1327_v21 }
  0xec   : > { %v454_v27 = vpop.permute.xlu0 %453  ;;  %v464_v37 = vpop.permute.xlu1 %463 }
  0xf0   : > { %v459_v31 = vpop.permute.xlu0 %458  ;;  %v469_v52 = vpop.permute.xlu1 %468 }
 0x14e   : > { %v522_v28 = vpop.f32.mrb[0].mxu0 }
 0x14f   : > { %v523_v29 = vadd.f32 %v522_v28, %v454_v27  ;;  %v524_v30 = vpop.f32.mrb[1].mxu0 }
 0x150   : > { %v525_v32 = vadd.f32 %v524_v30, %v454_v27  ;;  %v526_v33 = vpop.f32.mrb[2].mxu0 }
 0x151   : > { %v541_v34 = vmax.f32 %v523_v29, 0.0  ;;  %v527_v35 = vadd.f32 %v526_v33, %v459_v31  ;;  %v528_v36 = vpop.f32.mrb[3].mxu0  ;;  %v659_v29 = vpop.permute.xlu0 %658 }
 0x152   : > { %v542_v38 = vmax.f32 %v525_v32, 0.0  ;;  %v529_v39 = vadd.f32 %v528_v36, %v459_v31  ;;  %v664_v31 = vpop.permute.xlu1 %663 }
 0x153   : > { %v543_v40 = vmax.f32 %v527_v35, 0.0  ;;  %v553_v42 = vmul.f32 %v541_v34, %v541_v34 }
 0x154   : > { %v544_v41 = vmax.f32 %v529_v39, 0.0  ;;  %v554_v45 = vmul.f32 %v542_v38, %v542_v38 }
 0x155   : > { %v555_v43 = vmul.f32 %v543_v40, %v543_v40  ;;  %v1816_v44 = vpack.c.bf16 %v543_v40, %v541_v34 }
 0x156   : > { %v556_v46 = vmul.f32 %v544_v41, %v544_v41  ;;  %v532_v47 = vpop.f32.mrb[4].mxu0  ;;  %v550_v48 = vpack.c.bf16 %v544_v41, %v542_v38  ;;  %v674_v35 = vpop.permute.xlu1 %673 }
 0x157   : > { %v561_v49 = vadd.f32 %v555_v43, %v553_v42  ;;  %v533_v50 = vadd.f32 %v532_v47, %v464_v37  ;;  %v534_v51 = vpop.f32.mrb[5].mxu0 }
 0x158   : > { %v570_v53 = vadd.f32 %v556_v46, %v554_v45  ;;  %v535_v54 = vadd.f32 %v534_v51, %v464_v37  ;;  %v536_v55 = vpop.f32.mrb[6].mxu0  ;;  %599 = vmatprep.subr.bf16.mxu1 %v550_v48  ;;  %830 = vmatprep.mubr.bf16.mxu0 %v550_v48 }
 0x159   : > { %v545_v56 = vmax.f32 %v533_v50, 0.0  ;;  %v537_v57 = vadd.f32 %v536_v55, %v469_v52  ;;  %v538_v58 = vpop.f32.mrb[7].mxu0  ;;  %600 = vmatpush1.bf16.msra.mxu1 %v1816_v44 }
 0x15a   : > { %v546_v59 = vmax.f32 %v535_v54, 0.0  ;;  %v539_v60 = vadd.f32 %v538_v58, %v469_v52  ;;  %v696_v42 = vpop.permute.xlu1 %695 }
 0x15b   : > { %v557_v61 = vmul.f32 %v545_v56, %v545_v56  ;;  %v547_v62 = vmax.f32 %v537_v57, 0.0 }
 0x15c   : > { %v558_v63 = vmul.f32 %v546_v59, %v546_v59  ;;  %v548_v4 = vmax.f32 %v539_v60, 0.0 }
 0x15d   : > { %v562_v8 = vadd.f32 %v561_v49, %v557_v61  ;;  %v1819_v9 = vpack.c.bf16 %v547_v62, %v545_v56  ;;  %v559_v12 = vmul.f32 %v547_v62, %v547_v62 }
 0x15e   : > { %v571_v13 = vadd.f32 %v570_v53, %v558_v63  ;;  %v1821_v14 = vpack.c.bf16 %v548_v4, %v546_v59  ;;  %v560_v15 = vmul.f32 %v548_v4, %v548_v4  ;;  %v706_v61 = vpop.permute.xlu1 %705 }
 0x15f   : > { %v563_v16 = vadd.f32 %v562_v8, %v559_v12 }
 0x160   : > { %v572_v17 = vadd.f32 %v571_v13, %v560_v15  ;;  %601 = vmatprep.subr.bf16.mxu1 %v1821_v14 }
 0x161   : > { %602 = vmatpush1.bf16.msra.mxu1 %v1819_v9  ;;  %v564_v21 = vrot.slane %v563_v16, 4 }
 0x162   : > { %v573_v22 = vrot.slane %v572_v17, 4 }
 0x163   : > { %v565_v23 = vadd.f32 %v564_v21, %v563_v16 }
 0x164   : > { %1219 = vmatmul.mubr.msk.bf16.vlgmr.msra.gmra.mrb[0].mxu1 %vm481_vm0, %v1328_v18  ;;  %v574_v24 = vadd.f32 %v573_v22, %v572_v17 }
 0x165   : > { %641 = vmatprep.mubr.bf16.mxu1 %v1531_v0  ;;  %v566_v25 = vrot.slane %v565_v23, 2  ;;  %v669_v0 = vpop.permute.xlu0 %668 }
 0x166   : > { %v575_v26 = vrot.slane %v574_v24, 2 }
 0x167   : > { %v567_v27 = vadd.f32 %v566_v25, %v565_v23 }
 0x168   : > { %v576_v28 = vadd.f32 %v575_v26, %v574_v24 }
 0x169   : > { %v568_v30 = vrot.slane %v567_v27, 1  ;;  %v691_v39 = vpop.permute.xlu0 %690 }
 0x16a   : > { %v577_v32 = vrot.slane %v576_v28, 1 }
 0x16b   : > { %v569_v33 = vadd.f32 %v568_v30, %v567_v27 }
 0x16c   : > { %1220 = vmatmul.mubr.msk.bf16.gmra.mrb[4].mxu1 %vm481_vm0, %v1329_v19  ;;  %v578_v34 = vadd.f32 %v577_v32, %v576_v28 }
 0x16d   : > { %879 = vmatprep.mubr.bf16.mxu1 %v1532_v20  ;;  %v676_v36 = vmul.f32 %v659_v29, %v569_v33  ;;  %v678_v38 = vmul.f32 %v664_v31, %v569_v33  ;;  %v680_v54 = vmul.f32 %v669_v0, %v569_v33  ;;  %v682_v57 = vmul.f32 %v674_v35, %v569_v33  ;;  %v701_v58 = vpop.permute.xlu0 %700 }
 0x16e   : > { %v677_v37 = vmul.f32 %v659_v29, %v578_v34  ;;  %v679_v40 = vmul.f32 %v664_v31, %v578_v34  ;;  %v681_v56 = vmul.f32 %v669_v0, %v578_v34  ;;  %v683_v59 = vmul.f32 %v674_v35, %v578_v34 }
 0x16f   : > { %v708_v41 = vadd.f32 %v691_v39, %v676_v36  ;;  %v710_v48 = vadd.f32 %v696_v42, %v678_v38  ;;  %v712_v60 = vadd.f32 %v701_v58, %v680_v54  ;;  %v714_v12 = vadd.f32 %v706_v61, %v682_v57 }
 0x170   : > { %v709_v45 = vadd.f32 %v691_v39, %v677_v37  ;;  %v711_v51 = vadd.f32 %v696_v42, %v679_v40  ;;  %v713_v63 = vadd.f32 %v701_v58, %v681_v56  ;;  %v715_v16 = vadd.f32 %v706_v61, %v683_v59 }
 0x237   : > { %v633_v43 = vpop.f32.mrb[0].mxu1 }
 0x238   : > { %v716_v46 = vadd.f32 %v708_v41, %v633_v43  ;;  %v635_v47 = vpop.f32.mrb[1].mxu1 }
 0x239   : > { %v717_v49 = vadd.f32 %v709_v45, %v635_v47  ;;  %v637_v50 = vpop.f32.mrb[2].mxu1 }
 0x23a   : > { %v718_v52 = vadd.f32 %v710_v48, %v637_v50  ;;  %v639_v53 = vpop.f32.mrb[3].mxu1 }
 0x23b   : > { %v719_v55 = vadd.f32 %v711_v51, %v639_v53 }
 0x23f   : > { %v643_v62 = vpop.f32.mrb[4].mxu1 }
 0x240   : > { %v720_v4 = vadd.f32 %v712_v60, %v643_v62  ;;  %v645_v8 = vpop.f32.mrb[5].mxu1 }
 0x241   : > { %v721_v13 = vadd.f32 %v713_v63, %v645_v8  ;;  %v647_v15 = vpop.f32.mrb[6].mxu1 }
 0x242   : > { %v724_v17 = vmax.f32 %v716_v46, %v720_v4  ;;  %v722_v18 = vadd.f32 %v714_v12, %v647_v15  ;;  %v649_v19 = vpop.f32.mrb[7].mxu1 }
 0x243   : > { %v733_v21 = vmax.f32 %v717_v49, %v721_v13  ;;  %v723_v22 = vadd.f32 %v715_v16, %v649_v19 }
 0x244   : > { %v725_v23 = vmax.f32 %v718_v52, %v722_v18 }
 0x245   : > { %v734_v24 = vmax.f32 %v719_v55, %v723_v22 }
 0x246   : > { %v726_v25 = vmax.f32 %v724_v17, %v725_v23 }
 0x247   : > { %v735_v26 = vmax.f32 %v733_v21, %v734_v24 }
 0x248   : > { %v727_v27 = vrot.slane %v726_v25, 4 }
 0x249   : > { %v736_v28 = vrot.slane %v735_v26, 4 }
 0x24a   : > { %v728_v29 = vmax.f32 %v726_v25, %v727_v27 }
 0x24b   : > { %v737_v30 = vmax.f32 %v735_v26, %v736_v28 }
 0x24c   : > { %v729_v31 = vrot.slane %v728_v29, 2 }
 0x24d   : > { %v738_v32 = vrot.slane %v737_v30, 2 }
 0x24e   : > { %v730_v33 = vmax.f32 %v728_v29, %v729_v31 }
 0x24f   : > { %v739_v0 = vmax.f32 %v737_v30, %v738_v32 }
 0x250   : > { %v731_v34 = vrot.slane %v730_v33, 1 }
 0x251   : > { %v740_v35 = vrot.slane %v739_v0, 1 }
 0x252   : > { %v732_v36 = vmax.f32 %v730_v33, %v731_v34 }
 0x253   : > { %v741_v37 = vmax.f32 %v739_v0, %v740_v35 }
 0x254   : > { %v742_v38 = vsub.f32 %v716_v46, %v732_v36  ;;  %v744_v39 = vsub.f32 %v718_v52, %v732_v36  ;;  %v746_v40 = vsub.f32 %v720_v4, %v732_v36  ;;  %v748_v41 = vsub.f32 %v722_v18, %v732_v36 }
 0x255   : > { %v743_v42 = vsub.f32 %v717_v49, %v741_v37  ;;  %v745_v43 = vsub.f32 %v719_v55, %v741_v37  ;;  %v747_v45 = vsub.f32 %v721_v13, %v741_v37  ;;  %v749_v47 = vsub.f32 %v723_v22, %v741_v37 }
 0x256   : > { %v750_v48 = vmul.f32 1.442695, %v742_v38  ;;  %v754_v50 = vmul.f32 1.442695, %v744_v39  ;;  %v758_v51 = vmul.f32 1.442695, %v746_v40 }
 0x257   : > { %v762_v53 = vmul.f32 1.442695, %v748_v41  ;;  %v752_v54 = vmul.f32 1.442695, %v743_v42  ;;  %v756_v56 = vmul.f32 1.442695, %v745_v43  ;;  %v891_v42 = vlaneseq }
 0x258   : > { %1332 = vpow2.f32 %v750_v48  ;;  %v760_v57 = vmul.f32 1.442695, %v747_v45  ;;  %v764_v46 = vmul.f32 1.442695, %v749_v47 }
 0x259   : > { %1334 = vpow2.f32 %v754_v50  ;;  %v892_v43 = vshrl.u32 %v891_v42, 7  ;;  %v887_v50 = vld [vmem:[#allocation7] sm:$0xff] }
 0x25a   : > { %1336 = vpow2.f32 %v758_v51  ;;  %v888_v51 = vld [vmem:[#allocation7 + $0x8] sm:$0xff] }
 0x25b   : > { %1338 = vpow2.f32 %v762_v53  ;;  %v893_v45 = vsub.s32 0, %v892_v43  ;;  %v1331_v43 = vld [vmem:[%s1934_s9 + $0x8] sm:$0xff]  }
 0x25c   : > { %1340 = vpow2.f32 %v752_v54 }
 0x25d   : > { %1342 = vpow2.f32 %v756_v56 }
 0x25e   : > { %1344 = vpow2.f32 %v760_v57 }
 0x25f   : > { %1346 = vpow2.f32 %v764_v46 }
 0x262   : > { %v1333_v49 = vpop.eup %1332 }
 0x263   : > { %v1335_v52 = vpop.eup %1334 }
 0x264   : > { %v1337_v55 = vpop.eup %1336  ;;  %v766_v58 = vadd.f32 %v1335_v52, %v1333_v49 }
 0x265   : > { %v1339_v59 = vpop.eup %1338 }
 0x266   : > { %v1341_v60 = vpop.eup %1340  ;;  %v767_v61 = vadd.f32 %v1337_v55, %v766_v58 }
 0x267   : > { %v1343_v62 = vpop.eup %1342 }
 0x268   : > { %v768_v63 = vadd.f32 %v1339_v59, %v767_v61  ;;  %v775_v4 = vadd.f32 %v1343_v62, %v1341_v60  ;;  %v1345_v8 = vpop.eup %1344 }
 0x269   : > { %v1347_v15 = vpop.eup %1346 }
 0x26a   : > { %v769_v12 = vrot.slane %v768_v63, 4  ;;  %v776_v13 = vadd.f32 %v1345_v8, %v775_v4 }
 0x26c   : > { %v770_v16 = vadd.f32 %v769_v12, %v768_v63  ;;  %v777_v17 = vadd.f32 %v1347_v15, %v776_v13 }
 0x26e   : > { %v771_v18 = vrot.slane %v770_v16, 2  ;;  %v778_v19 = vrot.slane %v777_v17, 4 }
 0x270   : > { %v772_v21 = vadd.f32 %v771_v18, %v770_v16  ;;  %v779_v22 = vadd.f32 %v778_v19, %v777_v17 }
 0x272   : > { %v773_v23 = vrot.slane %v772_v21, 1  ;;  %v780_v24 = vrot.slane %v779_v22, 2 }
 0x274   : > { %v774_v25 = vadd.f32 %v773_v23, %v772_v21  ;;  %v781_v26 = vadd.f32 %v780_v24, %v779_v22 }
 0x276   : > { %1348 = vrcp.f32 %v774_v25  ;;  %v782_v27 = vrot.slane %v781_v26, 1 }
 0x278   : > { %v783_v28 = vadd.f32 %v782_v27, %v781_v26 }
 0x27a   : > { %1350 = vrcp.f32 %v783_v28 }
 0x280   : > { %v1349_v29 = vpop.eup %1348 }
 0x281   : > { %v786_v30 = vmul.f32 %v1349_v29, %v1333_v49  ;;  %v788_v31 = vmul.f32 %v1349_v29, %v1335_v52  ;;  %v790_v32 = vmul.f32 %v1349_v29, %v1337_v55  ;;  %v792_v33 = vmul.f32 %v1349_v29, %v1339_v59  ;;  %v890_v59 = vld [vmem:[#allocation7 + $0x18] sm:$0xff] }
 0x283   : > { %v794_v0 = vpack.c.bf16 %v788_v31, %v786_v30  ;;  %v796_v34 = vpack.c.bf16 %v792_v33, %v790_v32  ;;  %v1330_v33 = vld [vmem:[%s1934_s9] sm:$0xff]  }
 0x284   : > { %v1351_v35 = vpop.eup %1350 }
 0x285   : > { %v787_v36 = vmul.f32 %v1351_v35, %v1341_v60  ;;  %v789_v37 = vmul.f32 %v1351_v35, %v1343_v62  ;;  %v791_v38 = vmul.f32 %v1351_v35, %v1345_v8  ;;  %v793_v39 = vmul.f32 %v1351_v35, %v1347_v15  ;;  %v1222_v60 = vld [vmem:[%s1933_s8] ss:$0 sm:$0xff] }
 0x287   : > { %v795_v40 = vpack.c.bf16 %v789_v37, %v787_v36  ;;  %v797_v41 = vpack.c.bf16 %v793_v39, %v791_v38 }
 0x289   : > { %798 = vmatprep.subr.bf16.mxu0 %v795_v40  ;;  %847 = vmatprep.subr.bf16.mxu1 %v795_v40 }
 0x28a   : > { %799 = vmatpush1.bf16.xpose.msra.mxu0 %v794_v0  ;;  %848 = vmatpush1.bf16.xpose.msra.mxu1 %v794_v0 }
 0x28b   : > { %800 = vmatprep.subr.bf16.mxu0 %v797_v41  ;;  %849 = vmatprep.subr.bf16.mxu1 %v797_v41 }
 0x292   : > { %801 = vmatpush1.bf16.xpose.msra.mxu0 %v796_v34  ;;  %850 = vmatpush1.bf16.xpose.msra.mxu1 %v796_v34 }
 0x299   : > { %831 = vmatmul.mubr.bf16.vlgmr.msra.gmra.mrb[8].mxu0 %v1816_v44  ;;  %880 = vmatmul.mubr.bf16.vlgmr.msra.gmra.mrb[8].mxu1 %v1532_v20 }
 0x29a   : > { %838 = vmatprep.mubr.bf16.mxu0 %v1821_v14  ;;  %v889_v14 = vld [vmem:[#allocation7 + $0x10] sm:$0xff]  ;;  %1242 = vmatprep.mubr.msk.bf16.mxu1 %vm481_vm0, %v1330_v33 }
 0x2a1   : > { %839 = vmatmul.mubr.bf16.gmra.mrb[12].mxu0 %v1819_v9  ;;  %v1221_v9 = vld [vmem:[%s1932_s7] ss:$0 sm:$0xff] }
 0x36c   : > { %v832_v47 = vpop.f32.mrb[8].mxu0  ;;  %v881_v48 = vpop.f32.mrb[8].mxu1 }
 0x36d   : > { %v894_v53 = vrot.slane %v881_v48, %v893_v45  ;;  %v834_v54 = vpop.f32.mrb[9].mxu0  ;;  %v883_v56 = vpop.f32.mrb[9].mxu1  ;;  %v954_v45 = vld [vmem:[%s1935_s10 + $0x10] sm:$0xff] }
 0x36e   : > { %v835_v57 = vpop.f32.mrb[10].mxu0  ;;  %v884_v46 = vpop.f32.mrb[10].mxu1  ;;  %v953_v54 = vld [vmem:[%s1935_s10 + $0x8] sm:$0xff] }
 0x36f   : > { %v895_v49 = vmul.f32 %v894_v53, %v887_v50  ;;  %v896_v44 = vmul.f32 %v894_v53, %v888_v51  ;;  %v837_v52 = vpop.f32.mrb[11].mxu0  ;;  %v885_v20 = vpop.f32.mrb[11].mxu1  ;;  %v897_v62 = vmul.f32 %v894_v53, %v889_v14  ;;  %v898_v13 = vmul.f32 %v894_v53, %v890_v59  ;;  %v955_v50 = vld [vmem:[%s1935_s10 + $0x18] sm:$0xff] }
 0x371   : > { %v900_v55 = vsub.f32 %v835_v57, %v896_v44  ;;  %v899_v58 = vsub.f32 %v832_v47, %v895_v49  ;;  %v952_v47 = vld [vmem:[%s1935_s10] sm:$0xff] }
 0x373   : > { %v911_v61 = vmul.f32 %v1221_v9, %v900_v55  ;;  %v910_v63 = vmul.f32 %v1221_v9, %v899_v58 }
 0x374   : > { %v840_v4 = vpop.f32.mrb[12].mxu0 }
 0x375   : > { %v901_v8 = vsub.f32 %v840_v4, %v897_v62  ;;  %v842_v12 = vpop.f32.mrb[13].mxu0  ;;  %v921_v15 = vadd.f32 %v1222_v60, %v910_v63  ;;  %v922_v16 = vadd.f32 %v1222_v60, %v911_v61 }
 0x376   : > { %v843_v17 = vpop.f32.mrb[14].mxu0 }
 0x377   : > { %v912_v18 = vmul.f32 %v1221_v9, %v901_v8  ;;  %v902_v19 = vsub.f32 %v843_v17, %v898_v13  ;;  %v845_v21 = vpop.f32.mrb[15].mxu0  ;;  %v925_v22 = vmax.f32 %v921_v15, 0.0  ;;  %v926_v23 = vmax.f32 %v922_v16, 0.0 }
 0x379   : > { %v913_v24 = vmul.f32 %v1221_v9, %v902_v19  ;;  %v929_v25 = vsel %vm481_vm0, %v925_v22, 0.0  ;;  %v932_v26 = vsel %vm481_vm0, %v926_v23, 0.0  ;;  %v923_v27 = vadd.f32 %v1222_v60, %v912_v18 }
 0x37a   : > { %930 = vadd.xlane.f32.xlu0 %v929_v25  ;;  %933 = vadd.xlane.f32.xlu1 %v932_v26 }
 0x37b   : > { %v927_v28 = vmax.f32 %v923_v27, 0.0  ;;  %v924_v29 = vadd.f32 %v1222_v60, %v913_v24 }
 0x37d   : > { %v935_v30 = vsel %vm481_vm0, %v927_v28, 0.0  ;;  %v928_v31 = vmax.f32 %v924_v29, 0.0 }
 0x37e   : > { %936 = vadd.xlane.f32.xlu0 %v935_v30 }
 0x37f   : > { %v938_v32 = vsel %vm481_vm0, %v928_v31, 0.0 }
 0x382   : > { %939 = vadd.xlane.f32.xlu0 %v938_v32 }
 0x407   : > { %v931_v0 = vpop.xlane.xlu0 %930  ;;  %v934_v34 = vpop.xlane.xlu1 %933 }
 0x408   : > { %v942_v35 = vmul.f32 0.03125, %v931_v0  ;;  %v943_v36 = vmul.f32 0.03125, %v934_v34 }
 0x40a   : > { %v950_v37 = vpack.c.bf16 %v943_v36, %v942_v35 }
 0x40b   : > { %v937_v38 = vpop.xlane.xlu0 %936 }
 0x40c   : > { %1238 = vmatprep.subr.bf16.mxu1 %v950_v37  ;;  %v944_v40 = vmul.f32 0.03125, %v937_v38 }
 0x40d   : > { %1239 = vmatpush3.bf16.msra.mxu1 %v950_v37 }
 0x40f   : > { %v940_v39 = vpop.xlane.xlu0 %939 }
 0x410   : > { %v945_v41 = vmul.f32 0.03125, %v940_v39 }
 0x412   : > { %v951_v42 = vpack.c.bf16 %v945_v41, %v944_v40 }
 0x414   : > { %1240 = vmatprep.subr.bf16.mxu1 %v951_v42 }
 0x415   : > { %1241 = vmatpush3.bf16.msra.mxu1 %v951_v42 }
 0x418   : > { %1243 = vmatmul.mubr.msk.bf16.vlgmr.msra.gmra.mrb[12].mxu1 %vm481_vm0, %v1331_v43 }
 0x4eb   : > { %v1244_v48 = vpop.f32.mrb[12].mxu1 }
 0x4ec   : > { %v1015_v51 = vadd.f32 %v1244_v48, %v954_v45  ;;  %v1006_v53 = vpop.f32.mrb[13].mxu1 }
 0x4ed   : > { %v1007_v56 = vadd.f32 %v1006_v53, %v952_v47  ;;  %v1245_v57 = vpop.f32.mrb[14].mxu1 }
 0x4ee   : > { %v1023_v46 = vsub.f32 0.0, %v1015_v51  ;;  %v1018_v49 = vadd.f32 %v1245_v57, %v955_v50  ;;  %v1009_v44 = vpop.f32.mrb[15].mxu1 }
 0x4ef   : > { %v1021_v52 = vsub.f32 0.0, %v1007_v56  ;;  %v1010_v20 = vadd.f32 %v1009_v44, %v953_v54 }
 0x4f0   : > { %v1029_v9 = vmul.f32 1.442695, %v1023_v46  ;;  %v1024_v14 = vsub.f32 0.0, %v1018_v49 }
 0x4f1   : > { %v1025_v55 = vmul.f32 1.442695, %v1021_v52  ;;  %v1022_v58 = vsub.f32 0.0, %v1010_v20 }
 0x4f2   : > { %1352 = vpow2.f32 %v1029_v9  ;;  %v1031_v59 = vmul.f32 1.442695, %v1024_v14 }
 0x4f3   : > { %1354 = vpow2.f32 %v1025_v55  ;;  %v1027_v60 = vmul.f32 1.442695, %v1022_v58 }
 0x4f4   : > { %1356 = vpow2.f32 %v1031_v59 }
 0x4f5   : > { %1358 = vpow2.f32 %v1027_v60 }
 0x4fc   : > { %v1353_v61 = vpop.eup %1352 }
 0x4fd   : > { %v1355_v62 = vpop.eup %1354  ;;  %v1035_v63 = vadd.f32 1.0, %v1353_v61 }
 0x4fe   : > { %v1357_v4 = vpop.eup %1356  ;;  %v1033_v8 = vadd.f32 1.0, %v1355_v62 }
 0x4ff   : > { %v1359_v12 = vpop.eup %1358  ;;  %v1036_v15 = vadd.f32 1.0, %v1357_v4 }
 0x500   : > { %1360 = vrcp.f32 %v1033_v8  ;;  %v1034_v13 = vadd.f32 1.0, %v1359_v12 }
 0x501   : > { %1362 = vrcp.f32 %v1035_v63 }
 0x502   : > { %1364 = vrcp.f32 %v1034_v13 }
 0x503   : > { %1366 = vrcp.f32 %v1036_v15 }
 0x50a   : > { %v1361_v16 = vpop.eup %1360 }
 0x50b   : > { %v1363_v17 = vpop.eup %1362  ;;  %v1045_v18 = vadd.f32 1.0, %v1361_v16 }
 0x50c   : > { %v1365_v19 = vpop.eup %1364  ;;  %v1047_v22 = vadd.f32 1.0, %v1363_v17 }
 0x50d   : > { %1051 = vperm.xlu1 %1325, %v1045_v18   ;;  %v1046_v21 = vadd.f32 1.0, %v1365_v19  ;;  %v1367_v23 = vpop.eup %1366 }
 0x50e   : > { %v1048_v24 = vadd.f32 1.0, %v1367_v23 }
 0x50f   : > { %1056 = vperm.xlu0 %1324, %v1046_v21  }
 0x511   : > { %1061 = vperm.xlu1 %1325, %v1047_v22  }
 0x515   : > { %1066 = vperm.xlu1 %1325, %v1048_v24  }
 0x58c   : > { %v1052_v25 = vpop.permute.xlu1 %1051 }
 0x58d   : > { %v1069_v26 = vmul.f32 %v1052_v25, %v1757_v3  ;;  %v1070_v27 = vmul.f32 %v1052_v25, %v1753_v1 }
 0x58e   : > { %v1057_v28 = vpop.permute.xlu0 %1056 }
 0x58f   : > { %v1077_v29 = vmax.f32 %v1069_v26, 0.0  ;;  %v1078_v30 = vmax.f32 %v1070_v27, 0.0  ;;  %v1071_v31 = vmul.f32 %v1057_v28, %v1761_v5  ;;  %v1072_v32 = vmul.f32 %v1057_v28, %v1755_v2 }
 0x590   : > { %v1062_v33 = vpop.permute.xlu1 %1061 }
 0x591   : > { %1085 = vst [vmem:[%s423_s15] sm:$0xff] %v1077_v29  ;;  %1086 = vst [vmem:[%s423_s15 + $0x8] sm:$0xff] %v1078_v30  ;;  %v1079_v0 = vmax.f32 %v1071_v31, 0.0  ;;  %v1080_v34 = vmax.f32 %v1072_v32, 0.0  ;;  %v1073_v35 = vmul.f32 %v1062_v33, %v1771_v10  ;;  %v1074_v3 = vmul.f32 %v1062_v33, %v1763_v6 }
 0x593   : > { %1087 = vst [vmem:[%s423_s15 + $0x10] sm:$0xff] %v1079_v0  ;;  %1088 = vst [vmem:[%s423_s15 + $0x18] sm:$0xff] %v1080_v34  ;;  %v1081_v1 = vmax.f32 %v1073_v35, 0.0  ;;  %v1082_v36 = vmax.f32 %v1074_v3, 0.0 }
 0x594   : > { %v1067_v5 = vpop.permute.xlu1 %1066 }
 0x595   : > { %1089 = vst [vmem:[%s423_s15 + $0x20] sm:$0xff] %v1081_v1  ;;  %1090 = vst [vmem:[%s423_s15 + $0x28] sm:$0xff] %v1082_v36  ;;  %v1075_v2 = vmul.f32 %v1067_v5, %v1773_v11  ;;  %v1076_v37 = vmul.f32 %v1067_v5, %v1765_v7 }
 0x597   : > { %v1083_v6 = vmax.f32 %v1075_v2, 0.0  ;;  %v1084_v10 = vmax.f32 %v1076_v37, 0.0 }
 0x599   : > { %1091 = vst [vmem:[%s423_s15 + $0x30] sm:$0xff] %v1083_v6  ;;  %1092 = vst [vmem:[%s423_s15 + $0x38] sm:$0xff] %v1084_v10 }
 0x59a   : > { %1465 = shalt.err (!%p1462_p9)
}
 0x59b   : > { %s1466_s25 = scalar_lea.hbm %s1880_s13, 1024  ;;  %s1470_s16 = scalar_lea.hbm %s1964_s29, 2048 }
 0x59c   : > { %p1467_p2 = scmp.ne.s32.totalorder %s1880_s13, %s1466_s25  ;;  %p1471_p5 = scmp.lt.u32.totalorder %s1880_s13, %s1964_s29 }
 0x59d   : > { %p1472_p10 = scmp.lt.u32.totalorder %s1470_s16, %s1466_s25  ;;  %p1474_p12 = scmp.lt.u32.totalorder %s1466_s25, %s1880_s13 }
 0x59e   : > { %p1468_p3 = pnand %p1467_p2, %p1965_p7 }
 0x59f   : > { %p1473_p4 = por %p1472_p10, %p1471_p5 }
 0x5a0   : > { %p1469_p0 = pneg %p1468_p3 }
 0x5a1   : > { %p1475_p8 = por %p1474_p12, %p1473_p4 }
 0x5a3   : > { %p1476_p11 = pnand %p1475_p8, %p1469_p0 }
 0x5a5   : > { %1479 = shalt.err (!%p1476_p11)
}
 0x5a6   : > { %s1534_s15 = smov 256   ;;  %s1535_s26 = smov 16  }
 0x5a7   : > { %1258 = dma.vmem_to_hbm [thread:$0]  (%p1965_p7), %s1875_s24, 1024, %s1880_s13, %s1884_s21, %s1534_s15, %s1534_s15, %s1535_s26  }
 0x5a8 PF: > { %s1966_s11 = sld [smem:[#allocation14_spill]]  ;;  %s1967_s23 = sld [smem:[#allocation12_spill]] }
 0x5a9   : > { %s1968_s22 = sld [smem:[#allocation17_spill]] }
 0x5ae   : > { %p1280_p13 = scmp.ge.s32.totalorder %s1966_s11, 2  ;;  %s1122_s17 = sand.u32 1, %s1967_s23  }
 0x5af   : > { %p1969_p1 = scmp.ne.s32.totalorder %s1968_s22, 0  ;;  %s1123_s20 = scalar_lea.sflag [#allocation4], %s1122_s17 }
 0x5b1   : > { %p1271_p6 = pnand %p1280_p13, %p1969_p1 }
 0x5b3   : > { %1505 = dma.done.wait (!%p1271_p6), %s1123_s20, 1024  }
 0x5b4   : > { %1507 = vsyncadd (!%p1271_p6), %s1123_s20, 4294966272  ;;  %s1970_s20 = sld [smem:[#allocation15_spill]]  ;;  %s1971_s28 = sld [smem:[#allocation13_spill]] }
 0x5b5   : > { %s1972_s19 = sld [smem:[#allocation16_spill]]  ;;  %s1973_s17 = smov %s1514_s18 }
 0x5ba   : > { %p23_p9 = scmp.ge.s32.totalorder %s1970_s20, 4   ;;  %s1974_s18 = smov %s1971_s28 }
 0x5bc   :  { %25 = sbr.rel (!%p23_p9) target bundleno = 7 (0x7), region = 112 }
 0x5c3   :  { %1128 = vsyncpa [#allocation3], 1 }
 0x5c4   :  { %1130 = vsyncpa [#allocation3 + $0x1], 1 }
 0x5c5   :  { %1131 = vsyncpa [#allocation6], 1 }
 0x5c6   :  { %1132 = vsyncpa [#allocation4], 1 }
 0x5c7   :  { %1134 = vsyncpa [#allocation4 + $0x1], 1 }

</bundles_post_ra>
